<compile_context>
chip_gen: v7x
topology: tpu7x:2x2x1
jax: 0.10.0
libtpu: 0.0.40
codegen_flags: <defaults>
</compile_context>

<pallas_src>
import functools
import math

import jax
import jax.numpy as jnp
from jax.experimental import pallas as pl
from jax.experimental.pallas import tpu as pltpu

_LANE = 128
_SUBLANE = 8


# ----------------------------------------------------------------------------
# Interpolation matrices
# ----------------------------------------------------------------------------
def _interp_matrix(out_size: int, in_size: int, mode: str) -> jnp.ndarray:
    """Row-interpolation matrix W (out_size, in_size): (W @ x) upsamples axis 0."""
    if mode == "nearest":
        # PyTorch legacy 'nearest': src = floor(dst * in/out)   (NOT nearest-exact)
        src = jnp.floor(jnp.arange(out_size) * (in_size / out_size)).astype(jnp.int32)
        src = jnp.clip(src, 0, in_size - 1)
        return (
            jnp.zeros((out_size, in_size), jnp.float32)
            .at[jnp.arange(out_size), src]
            .set(1.0)
        )
    # bilinear, align_corners=True: src = dst * (in-1)/(out-1)
    if in_size == 1:
        return jnp.ones((out_size, in_size), jnp.float32)
    coords = jnp.arange(out_size, dtype=jnp.float32) * (
        (in_size - 1) / max(out_size - 1, 1)
    )
    lo = jnp.clip(jnp.floor(coords).astype(jnp.int32), 0, in_size - 2)
    frac = coords - lo.astype(jnp.float32)
    rows = jnp.arange(out_size)
    w = jnp.zeros((out_size, in_size), jnp.float32)
    w = w.at[rows, lo].add(1.0 - frac)
    w = w.at[rows, lo + 1].add(frac)
    return w


# ----------------------------------------------------------------------------
# Hardware queries (safe fallbacks — never fail)
# ----------------------------------------------------------------------------
def _vmem_limit_bytes() -> int:
    cap = 0
    try:
        info = pltpu.get_tpu_info()
        cap = int(getattr(info, "vmem_capacity_bytes", 0) or 0)
    except Exception:
        cap = 0
    if cap <= 0:
        # Conservative fallback: fits v7x's 64 MiB physical VMEM.
        return 48 * 1024 * 1024
    # Leave ~16 MiB for compiler-internal scratch; never request more than 96 MiB.
    return int(max(32 * 1024 * 1024, min(cap - 16 * 1024 * 1024, 96 * 1024 * 1024)))


def _num_tensorcores() -> int:
    try:
        info = pltpu.get_tpu_info()
        for name in ("num_cores", "core_count", "num_tensorcores", "tensorcore_count"):
            v = getattr(info, name, None)
            if v:
                return max(1, int(v))
    except Exception:
        pass
    try:
        kind = str(getattr(jax.devices()[0], "device_kind", "")).lower()
        if "v7" in kind or "tpu7" in kind or "tpu 7" in kind:
            return 2  # v7x has 2 TensorCores per chip
    except Exception:
        pass
    return 1


# ----------------------------------------------------------------------------
# VMEM footprint model & block-size selection
# ----------------------------------------------------------------------------
def _ceil_to(n: int, m: int) -> int:
    return -(-n // m) * m


def _tile_bytes(rows: int, cols: int, itemsize: int) -> int:
    """(8,128)-padded VMEM footprint of a (rows, cols) tile."""
    return _ceil_to(max(rows, 1), _SUBLANE) * _ceil_to(max(cols, 1), _LANE) * itemsize


def _kron_footprint(b, hw_in, hw_out, isz):
    return (
        2 * _tile_bytes(b, hw_in, isz)          # x block (double-buffered)
        + 2 * _tile_bytes(b, hw_out, isz)       # out block (double-buffered)
        + 2 * _tile_bytes(hw_in, hw_out, isz)   # resident kron weight (2 bufs)
        + _tile_bytes(b, hw_out, 4)             # f32 accumulator before cast
    )


def _two_pass_footprint(b, h_in, w_in, h_out, w_out, isz):
    return (
        2 * _tile_bytes(b * h_in, w_in, isz)          # x block
        + 2 * _tile_bytes(b * h_out, w_out, isz)      # out block
        + 2 * _tile_bytes(w_in, w_out, isz)           # Ww^T (resident but 2 bufs)
        + 2 * _tile_bytes(b * h_out, b * h_in, isz)   # block-diag(Wh)
        + _tile_bytes(b * h_in, w_out, 4)             # width-pass f32 intermediate
        + _tile_bytes(b * h_in, w_out, isz)           # its cast back to compute dtype
        + _tile_bytes(b * h_out, w_out, 4)            # height-pass f32 accumulator
    )


def _prefer_balanced(cands_desc, nc, num_cores):
    """Among fitting candidates (descending), prefer a balanced multi-core grid."""
    if num_cores >= 2 and nc >= 2:
        for b in cands_desc:
            steps = -(-nc // b)
            if steps >= num_cores and steps % num_cores == 0:
                return b
    return cands_desc[0]


def _pick_b_kron(nc, hw_in, hw_out, isz, budget, num_cores):
    cands = set()
    if _kron_footprint(nc, hw_in, hw_out, isz) <= budget:
        cands.add(nc)  # full second-minor dim: always layout-legal
    b = 8
    while b <= min(nc, 2048):
        if _kron_footprint(b, hw_in, hw_out, isz) <= budget:
            cands.add(b)
        b += 8
    if not cands:
        return nc if nc <= 8 else 8
    return _prefer_balanced(sorted(cands, reverse=True), nc, num_cores)


def _pick_b_two_pass(nc, h_in, w_in, h_out, w_out, isz, budget, num_cores):
    # (b*h_in) must be a multiple of 8 (sublane) unless the block is the full dim.
    b0 = 8 // math.gcd(h_in, 8)
    cands = set()
    if _two_pass_footprint(nc, h_in, w_in, h_out, w_out, isz) <= budget:
        cands.add(nc)
    b = b0
    while b <= min(nc, 512):
        if _two_pass_footprint(b, h_in, w_in, h_out, w_out, isz) <= budget:
            cands.add(b)
        b += b0
    if not cands:
        return nc if nc <= b0 else b0
    return _prefer_balanced(sorted(cands, reverse=True), nc, num_cores)


# ----------------------------------------------------------------------------
# Kernels
# ----------------------------------------------------------------------------
def _kron_kernel(kt_ref, x_ref, o_ref):
    # kt_ref : (Hin*Win, Hout*Wout)   resident
    # x_ref  : (B, Hin*Win)           o_ref : (B, Hout*Wout)
    # One MXU matmul, one unmasked lane-dense full-block store.
    o_ref[...] = jnp.dot(
        x_ref[...], kt_ref[...], preferred_element_type=jnp.float32
    ).astype(o_ref.dtype)


def _two_pass_kernel(whbd_ref, wwt_ref, x_ref, o_ref):
    # whbd_ref : (B*Hout, B*Hin)  block-diag(Wh), resident
    # wwt_ref  : (Win, Wout)      resident
    # x_ref    : (B*Hin, Win)     o_ref : (B*Hout, Wout)
    # Width pass: one big matmul over all B channel slabs at once.
    t = jnp.dot(x_ref[...], wwt_ref[...], preferred_element_type=jnp.float32)
    # Height pass: single large-K matmul (block-diag keeps channels separate),
    # single full-block store (no masked per-slab partial stores).
    o = jnp.dot(
        whbd_ref[...], t.astype(whbd_ref.dtype), preferred_element_type=jnp.float32
    )
    o_ref[...] = o.astype(o_ref.dtype)


# ----------------------------------------------------------------------------
# Wrapper
# ----------------------------------------------------------------------------
@functools.partial(jax.jit, static_argnames=("scale", "mode"))
def pure_upsampling(x: jnp.ndarray, scale: int = 2, mode: str = "bilinear") -> jnp.ndarray:
    """Equivalent of PureUpsampling(scale, mode).forward(x) for NCHW input."""
    if mode not in ("bilinear", "nearest"):
        raise ValueError(f"unsupported mode: {mode}")
    n, c, h_in, w_in = x.shape
    h_out, w_out = h_in * scale, w_in * scale
    nc = n * c
    cdt = x.dtype
    isz = jnp.dtype(cdt).itemsize

    vmem_limit = _vmem_limit_bytes()
    budget = (vmem_limit * 3) // 4  # keep ~25% headroom for compiler scratch
    num_cores = _num_tensorcores()

    wh = _interp_matrix(h_out, h_in, mode)  # (Hout, Hin), f32
    ww = _interp_matrix(w_out, w_in, mode)  # (Wout, Win), f32

    hw_in, hw_out = h_in * w_in, h_out * w_out
    kron_w_bytes = 2 * _tile_bytes(hw_in, hw_out, isz)
    use_kron = (hw_out <= 4096 or w_out < 128) and (kron_w_bytes <= budget // 2)

    compiler_params = pltpu.CompilerParams(
        dimension_semantics=("parallel",),
        vmem_limit_bytes=int(vmem_limit),
    )

    if use_kron:
        # ---- small-spatial fast path: single lane-dense matmul per block -----
        b = _pick_b_kron(nc, hw_in, hw_out, isz, budget, num_cores)
        kt = jnp.kron(wh, ww).T.astype(cdt)  # (Hin*Win, Hout*Wout)
        x2d = x.reshape(nc, hw_in)           # free contiguous reshape
        # NOTE: block boundaries always align with whole channel rows, so a
        # ragged tail block (nc % b != 0) only reads/writes garbage rows that
        # Pallas masks on store — never mixed into valid channels.
        out2d = pl.pallas_call(
            _kron_kernel,
            out_shape=jax.ShapeDtypeStruct((nc, hw_out), cdt),
            grid_spec=pltpu.PrefetchScalarGridSpec(
                num_scalar_prefetch=0,
                grid=(pl.cdiv(nc, b),),
                in_specs=[
                    pl.BlockSpec((hw_in, hw_out), lambda i: (0, 0)),  # kron weight
                    pl.BlockSpec((b, hw_in), lambda i: (i, 0)),       # x rows
                ],
                out_specs=pl.BlockSpec((b, hw_out), lambda i: (i, 0)),
            ),
            compiler_params=compiler_params,
        )(kt, x2d)
        return out2d.reshape(n, c, h_out, w_out)

    # ---- general path: width matmul + block-diag height matmul ---------------
    b = _pick_b_two_pass(nc, h_in, w_in, h_out, w_out, isz, budget, num_cores)
    whbd = jnp.kron(jnp.eye(b, dtype=jnp.float32), wh).astype(cdt)  # (b*Hout, b*Hin)
    wwt = ww.T.astype(cdt)                                          # (Win, Wout)
    # Flatten (N,C,H,W) -> (N*C*H, W): free reshape; each grid step sees b whole
    # channel slabs as one 2-D block (boundaries always on channel multiples).
    x2d = x.reshape(nc * h_in, w_in)
    out2d = pl.pallas_call(
        _two_pass_kernel,
        out_shape=jax.ShapeDtypeStruct((nc * h_out, w_out), cdt),
        grid_spec=pltpu.PrefetchScalarGridSpec(
            num_scalar_prefetch=0,
            grid=(pl.cdiv(nc, b),),
            in_specs=[
                pl.BlockSpec((b * h_out, b * h_in), lambda i: (0, 0)),  # block-diag Wh
                pl.BlockSpec((w_in, w_out), lambda i: (0, 0)),          # Ww^T
                pl.BlockSpec((b * h_in, w_in), lambda i: (i, 0)),       # x block
            ],
            out_specs=pl.BlockSpec((b * h_out, w_out), lambda i: (i, 0)),
        ),
        compiler_params=compiler_params,
    )(whbd, wwt, x2d)
    return out2d.reshape(n, c, h_out, w_out)


# ----------------------------------------------------------------------------
# Pure-JAX references (for the sanity check only)
# ----------------------------------------------------------------------------
def _reference_bilinear_align_corners(x, scale):
    n, c, h_in, w_in = x.shape
    h_out, w_out = h_in * scale, w_in * scale
    ys = jnp.arange(h_out, dtype=jnp.float32) * ((h_in - 1) / max(h_out - 1, 1))
    xs = jnp.arange(w_out, dtype=jnp.float32) * ((w_in - 1) / max(w_out - 1, 1))
    y0 = jnp.clip(jnp.floor(ys).astype(jnp.int32), 0, h_in - 2)
    x0 = jnp.clip(jnp.floor(xs).astype(jnp.int32), 0, w_in - 2)
    fy = (ys - y0)[None, None, :, None]
    fx = (xs - x0)[None, None, None, :]
    g = lambda yi, xi: x[:, :, yi, :][:, :, :, xi]
    top = g(y0, x0) * (1 - fx) + g(y0, x0 + 1) * fx
    bot = g(y0 + 1, x0) * (1 - fx) + g(y0 + 1, x0 + 1) * fx
    return top * (1 - fy) + bot * fy


if __name__ == "__main__":
    key = jax.random.PRNGKey(0)
    k0, k1 = jax.random.split(key)

    # ---- small-spatial (Kronecker) path --------------------------------------
    x = jax.random.normal(k0, (2, 4, 16, 16), dtype=jnp.float32)
    out = jax.block_until_ready(pure_upsampling(x, scale=2, mode="bilinear"))
    assert out.shape == (2, 4, 32, 32), out.shape
    ref = _reference_bilinear_align_corners(x, 2)
    assert jnp.allclose(out, ref, atol=1e-4, rtol=1e-4), float(
        jnp.max(jnp.abs(out - ref))
    )

    # nearest (legacy): src = floor(dst * in/out) = dst // 2 for scale 2
    out_n = jax.block_until_ready(pure_upsampling(x, scale=2, mode="nearest"))
    idx = jnp.arange(32) // 2
    ref_n = x[:, :, idx, :][:, :, :, idx]
    assert out_n.shape == (2, 4, 32, 32), out_n.shape
    assert jnp.allclose(out_n, ref_n, atol=1e-6, rtol=1e-6), float(
        jnp.max(jnp.abs(out_n - ref_n))
    )

    # ---- larger-spatial (two-pass block-diag) path ---------------------------
    x2 = jax.random.normal(k1, (1, 2, 40, 72), dtype=jnp.float32)
    out2 = jax.block_until_ready(pure_upsampling(x2, scale=2, mode="bilinear"))
    assert out2.shape == (1, 2, 80, 144), out2.shape
    ref2 = _reference_bilinear_align_corners(x2, 2)
    assert jnp.allclose(out2, ref2, atol=1e-4, rtol=1e-4), float(
        jnp.max(jnp.abs(out2 - ref2))
    )

    print("KERNEL_OK")
</pallas_src>

<mosaic_0001>
module attributes {stable_mosaic.version = 11 : i64} {
  func.func private @main(%arg0: i32) attributes {dimension_semantics = [#tpu.dimension_semantics<core_parallel>], iteration_bounds = array<i64: 2>, tpu.core_type = #tpu.core_type<sc_scalar_subcore>, window_params = []} {
    return
  }
}

module attributes {stable_mosaic.version = 11 : i64} {
  func.func private @main(%arg0: i32) attributes {dimension_semantics = [#tpu.dimension_semantics<core_parallel>], iteration_bounds = array<i64: 2>, tpu.core_type = #tpu.core_type<sc_scalar_subcore>, window_params = []} {
    return
  }
}

module attributes {stable_mosaic.version = 11 : i64} {
  func.func @_kron_kernel(%arg0: i32, %arg1: memref<256x1024xf32, #tpu.memory_space<vmem>>, %arg2: memref<8x256xf32, #tpu.memory_space<vmem>>, %arg3: memref<8x1024xf32, #tpu.memory_space<vmem>>) attributes {dimension_semantics = [#tpu.dimension_semantics<parallel>], iteration_bounds = array<i64: 1>, scalar_prefetch = 0 : i64, scratch_operands = 0 : i64, tpu.core_type = #tpu.core_type<tc>, window_params = [{pipeline_mode = #tpu.pipeline_mode<synchronous>, transform_indices = @transform_0, window_bounds = array<i64: 256, 1024>}, {transform_indices = @transform_1, window_bounds = array<i64: 8, 256>}, {transform_indices = @transform_2, window_bounds = array<i64: 8, 1024>}]} {
    %c0 = arith.constant 0 : index
    %c0_0 = arith.constant 0 : index
    %0 = vector.load %arg2[%c0, %c0_0] : memref<8x256xf32, #tpu.memory_space<vmem>>, vector<8x256xf32>
    %c0_1 = arith.constant 0 : index
    %c0_2 = arith.constant 0 : index
    %1 = vector.load %arg1[%c0_1, %c0_2] : memref<256x1024xf32, #tpu.memory_space<vmem>>, vector<256x1024xf32>
    %cst = arith.constant dense<0.000000e+00> : vector<8x1024xf32>
    %2 = tpu.matmul %0, %1, %cst {dimension_numbers = #tpu.dot_dimension_numbers<[1], [0], [0], [1], [0, 0, 1, 1], [], []>} : vector<8x256xf32>, vector<256x1024xf32>, vector<8x1024xf32> -> vector<8x1024xf32>
    %c0_3 = arith.constant 0 : index
    %c0_4 = arith.constant 0 : index
    %3 = vector.load %arg3[%c0_3, %c0_4] : memref<8x1024xf32, #tpu.memory_space<vmem>>, vector<8x1024xf32>
    tpu.vector_store %arg3[%c0_3, %c0_4], %2 {strides = array<i32>} : memref<8x1024xf32, #tpu.memory_space<vmem>>, vector<8x1024xf32>,
    return
  }
  func.func @transform_0(%arg0: i32) -> (i32, i32) {
    %c0_i32 = arith.constant 0 : i32
    %c0_i32_0 = arith.constant 0 : i32
    %c0_i32_1 = arith.constant 0 : i32
    return %c0_i32, %c0_i32_0 : i32, i32
  }
  func.func @transform_1(%arg0: i32) -> (i32, i32) {
    %c0_i32 = arith.constant 0 : i32
    %c0_i32_0 = arith.constant 0 : i32
    return %arg0, %c0_i32 : i32, i32
  }
  func.func @transform_2(%arg0: i32) -> (i32, i32) {
    %c0_i32 = arith.constant 0 : i32
    %c0_i32_0 = arith.constant 0 : i32
    return %arg0, %c0_i32 : i32, i32
  }
}

</mosaic_0001>

<bundles_post_ra>
// kernel: pure_upsampling.1
= control target key start
LH: loop header
LB: loop body
LE: loop exit
PB: predicated region body
PF: predicated region fallthrough
CT: control target
= control target key end

     0   :  { %s1646_s0 = inlined_call_operand.vmem [shape: f32[256,1024], index: 0, kind: input, shape index: {}]   ;;  %s1647_s1 = inlined_call_operand.vmem [shape: f32[8,256], index: 1, kind: input, shape index: {}]   ;;  %s1648_s2 = inlined_call_operand.vmem [shape: f32[8,1024], index: 2, kind: output, shape index: {}]  }
   0x1   :  { %v14_v0 = vld [vmem:[%s1646_s0 + $0x8] sm:$0xff]  ;;  %v16_v2 = vld [vmem:[%s1646_s0 + $0x18] sm:$0xff]  ;;  %v13_v5 = vld [vmem:[%s1646_s0] sm:$0xff] }
   0x2   :  { %v22_v1 = vld [vmem:[%s1646_s0 + $0x48] sm:$0xff]  ;;  %v24_v4 = vld [vmem:[%s1646_s0 + $0x58] sm:$0xff]  ;;  %v21_v6 = vld [vmem:[%s1646_s0 + $0x40] sm:$0xff] }
   0x3   :  { %v565_v3 = vpack.c.bf16 %v22_v1, %v14_v0  ;;  %v629_v7 = vpack.c.bf16 %v24_v4, %v16_v2  ;;  %v567_v8 = vpack.c.bf16 %v21_v6, %v13_v5  ;;  %v15_v9 = vld [vmem:[%s1646_s0 + $0x10] sm:$0xff]  ;;  %v30_v11 = vld [vmem:[%s1646_s0 + $0x88] sm:$0xff]  ;;  %v32_v14 = vld [vmem:[%s1646_s0 + $0x98] sm:$0xff] }
   0x4   :  { %v23_v10 = vld [vmem:[%s1646_s0 + $0x50] sm:$0xff]  ;;  %v38_v13 = vld [vmem:[%s1646_s0 + $0xc8] sm:$0xff]  ;;  %v40_v15 = vld [vmem:[%s1646_s0 + $0xd8] sm:$0xff] }
   0x5   :  { %566 = vmatprep.subr.bf16.mxu0 %v565_v3  ;;  %v631_v12 = vpack.c.bf16 %v23_v10, %v15_v9  ;;  %630 = vmatprep.subr.bf16.mxu1 %v629_v7  ;;  %v569_v16 = vpack.c.bf16 %v38_v13, %v30_v11  ;;  %v633_v17 = vpack.c.bf16 %v40_v15, %v32_v14  ;;  %v29_v18 = vld [vmem:[%s1646_s0 + $0x80] sm:$0xff]  ;;  %v31_v20 = vld [vmem:[%s1646_s0 + $0x90] sm:$0xff]  ;;  %v46_v23 = vld [vmem:[%s1646_s0 + $0x108] sm:$0xff] }
   0x6   :  { %568 = vmatpush1.bf16.msra.mxu0 %v567_v8  ;;  %v37_v19 = vld [vmem:[%s1646_s0 + $0xc0] sm:$0xff]  ;;  %v39_v22 = vld [vmem:[%s1646_s0 + $0xd0] sm:$0xff]  ;;  %v54_v24 = vld [vmem:[%s1646_s0 + $0x148] sm:$0xff] }
   0x7   :  { %632 = vmatpush1.bf16.msra.mxu1 %v631_v12  ;;  %v571_v21 = vpack.c.bf16 %v37_v19, %v29_v18  ;;  %570 = vmatprep.subr.bf16.mxu0 %v569_v16  ;;  %v635_v25 = vpack.c.bf16 %v39_v22, %v31_v20  ;;  %v573_v26 = vpack.c.bf16 %v54_v24, %v46_v23  ;;  %v48_v27 = vld [vmem:[%s1646_s0 + $0x118] sm:$0xff]  ;;  %v45_v29 = vld [vmem:[%s1646_s0 + $0x100] sm:$0xff]  ;;  %v47_v32 = vld [vmem:[%s1646_s0 + $0x110] sm:$0xff] }
   0x8   :  { %634 = vmatprep.subr.bf16.mxu1 %v633_v17  ;;  %v56_v28 = vld [vmem:[%s1646_s0 + $0x158] sm:$0xff]  ;;  %v53_v31 = vld [vmem:[%s1646_s0 + $0x140] sm:$0xff]  ;;  %v55_v33 = vld [vmem:[%s1646_s0 + $0x150] sm:$0xff] }
   0x9   :  { %v637_v30 = vpack.c.bf16 %v56_v28, %v48_v27  ;;  %v575_v34 = vpack.c.bf16 %v53_v31, %v45_v29  ;;  %v62_v35 = vld [vmem:[%s1646_s0 + $0x188] sm:$0xff]  ;;  %v64_v37 = vld [vmem:[%s1646_s0 + $0x198] sm:$0xff]  ;;  %v639_v38 = vpack.c.bf16 %v55_v33, %v47_v32  ;;  %v61_v41 = vld [vmem:[%s1646_s0 + $0x180] sm:$0xff] }
   0xa   :  { %572 = vmatpush1.bf16.msra.mxu0 %v571_v21  ;;  %v70_v36 = vld [vmem:[%s1646_s0 + $0x1c8] sm:$0xff]  ;;  %v72_v40 = vld [vmem:[%s1646_s0 + $0x1d8] sm:$0xff]  ;;  %v69_v42 = vld [vmem:[%s1646_s0 + $0x1c0] sm:$0xff] }
   0xb   :  { %636 = vmatpush1.bf16.msra.mxu1 %v635_v25  ;;  %574 = vmatprep.subr.bf16.mxu0 %v573_v26  ;;  %v577_v39 = vpack.c.bf16 %v70_v36, %v62_v35  ;;  %v641_v43 = vpack.c.bf16 %v72_v40, %v64_v37  ;;  %v63_v44 = vld [vmem:[%s1646_s0 + $0x190] sm:$0xff]  ;;  %v78_v46 = vld [vmem:[%s1646_s0 + $0x208] sm:$0xff]  ;;  %v80_v48 = vld [vmem:[%s1646_s0 + $0x218] sm:$0xff]  ;;  %v579_v50 = vpack.c.bf16 %v69_v42, %v61_v41 }
   0xc   :  { %638 = vmatprep.subr.bf16.mxu1 %v637_v30  ;;  %v71_v45 = vld [vmem:[%s1646_s0 + $0x1d0] sm:$0xff]  ;;  %v86_v47 = vld [vmem:[%s1646_s0 + $0x248] sm:$0xff]  ;;  %v88_v49 = vld [vmem:[%s1646_s0 + $0x258] sm:$0xff] }
   0xd   :  { %v643_v51 = vpack.c.bf16 %v71_v45, %v63_v44  ;;  %v581_v52 = vpack.c.bf16 %v86_v47, %v78_v46  ;;  %v77_v53 = vld [vmem:[%s1646_s0 + $0x200] sm:$0xff]  ;;  %v79_v55 = vld [vmem:[%s1646_s0 + $0x210] sm:$0xff]  ;;  %v645_v56 = vpack.c.bf16 %v88_v49, %v80_v48  ;;  %v94_v58 = vld [vmem:[%s1646_s0 + $0x288] sm:$0xff] }
   0xe   :  { %576 = vmatpush1.bf16.msra.mxu0 %v575_v34  ;;  %v85_v54 = vld [vmem:[%s1646_s0 + $0x240] sm:$0xff]  ;;  %v87_v57 = vld [vmem:[%s1646_s0 + $0x250] sm:$0xff]  ;;  %v102_v59 = vld [vmem:[%s1646_s0 + $0x2c8] sm:$0xff] }
   0xf   :  { %640 = vmatpush1.bf16.msra.mxu1 %v639_v38  ;;  %578 = vmatprep.subr.bf16.mxu0 %v577_v39  ;;  %v96_v60 = vld [vmem:[%s1646_s0 + $0x298] sm:$0xff]  ;;  %v583_v62 = vpack.c.bf16 %v85_v54, %v77_v53  ;;  %v647_v63 = vpack.c.bf16 %v87_v57, %v79_v55  ;;  %v585_v0 = vpack.c.bf16 %v102_v59, %v94_v58  ;;  %v93_v1 = vld [vmem:[%s1646_s0 + $0x280] sm:$0xff]  ;;  %v95_v3 = vld [vmem:[%s1646_s0 + $0x290] sm:$0xff] }
  0x10   :  { %642 = vmatprep.subr.bf16.mxu1 %v641_v43  ;;  %v104_v61 = vld [vmem:[%s1646_s0 + $0x2d8] sm:$0xff]  ;;  %v101_v2 = vld [vmem:[%s1646_s0 + $0x2c0] sm:$0xff]  ;;  %v103_v5 = vld [vmem:[%s1646_s0 + $0x2d0] sm:$0xff] }
  0x11   :  { %v649_v4 = vpack.c.bf16 %v104_v61, %v96_v60  ;;  %v110_v6 = vld [vmem:[%s1646_s0 + $0x308] sm:$0xff]  ;;  %v112_v8 = vld [vmem:[%s1646_s0 + $0x318] sm:$0xff]  ;;  %v587_v10 = vpack.c.bf16 %v101_v2, %v93_v1  ;;  %v651_v11 = vpack.c.bf16 %v103_v5, %v95_v3  ;;  %v109_v13 = vld [vmem:[%s1646_s0 + $0x300] sm:$0xff] }
  0x12   :  { %580 = vmatpush1.bf16.msra.mxu0 %v579_v50  ;;  %v118_v7 = vld [vmem:[%s1646_s0 + $0x348] sm:$0xff]  ;;  %v120_v9 = vld [vmem:[%s1646_s0 + $0x358] sm:$0xff]  ;;  %v117_v14 = vld [vmem:[%s1646_s0 + $0x340] sm:$0xff] }
  0x13   :  { %644 = vmatpush1.bf16.msra.mxu1 %v643_v51  ;;  %582 = vmatprep.subr.bf16.mxu0 %v581_v52  ;;  %v589_v12 = vpack.c.bf16 %v118_v7, %v110_v6  ;;  %v111_v15 = vld [vmem:[%s1646_s0 + $0x310] sm:$0xff]  ;;  %v653_v16 = vpack.c.bf16 %v120_v9, %v112_v8  ;;  %v126_v18 = vld [vmem:[%s1646_s0 + $0x388] sm:$0xff]  ;;  %v128_v20 = vld [vmem:[%s1646_s0 + $0x398] sm:$0xff]  ;;  %v591_v22 = vpack.c.bf16 %v117_v14, %v109_v13 }
  0x14   :  { %646 = vmatprep.subr.bf16.mxu1 %v645_v56  ;;  %v119_v17 = vld [vmem:[%s1646_s0 + $0x350] sm:$0xff]  ;;  %v134_v19 = vld [vmem:[%s1646_s0 + $0x3c8] sm:$0xff]  ;;  %v136_v21 = vld [vmem:[%s1646_s0 + $0x3d8] sm:$0xff] }
  0x15   :  { %v655_v23 = vpack.c.bf16 %v119_v17, %v111_v15  ;;  %v593_v24 = vpack.c.bf16 %v134_v19, %v126_v18  ;;  %v125_v25 = vld [vmem:[%s1646_s0 + $0x380] sm:$0xff]  ;;  %v127_v27 = vld [vmem:[%s1646_s0 + $0x390] sm:$0xff]  ;;  %v657_v28 = vpack.c.bf16 %v136_v21, %v128_v20  ;;  %v142_v30 = vld [vmem:[%s1646_s0 + $0x408] sm:$0xff] }
  0x16   :  { %584 = vmatpush1.bf16.msra.mxu0 %v583_v62  ;;  %v133_v26 = vld [vmem:[%s1646_s0 + $0x3c0] sm:$0xff]  ;;  %v135_v29 = vld [vmem:[%s1646_s0 + $0x3d0] sm:$0xff]  ;;  %v150_v31 = vld [vmem:[%s1646_s0 + $0x448] sm:$0xff] }
  0x17   :  { %648 = vmatpush1.bf16.msra.mxu1 %v647_v63  ;;  %586 = vmatprep.subr.bf16.mxu0 %v585_v0  ;;  %v144_v32 = vld [vmem:[%s1646_s0 + $0x418] sm:$0xff]  ;;  %v595_v34 = vpack.c.bf16 %v133_v26, %v125_v25  ;;  %v659_v35 = vpack.c.bf16 %v135_v29, %v127_v27  ;;  %v597_v36 = vpack.c.bf16 %v150_v31, %v142_v30  ;;  %v141_v37 = vld [vmem:[%s1646_s0 + $0x400] sm:$0xff]  ;;  %v143_v39 = vld [vmem:[%s1646_s0 + $0x410] sm:$0xff] }
  0x18   :  { %650 = vmatprep.subr.bf16.mxu1 %v649_v4  ;;  %v152_v33 = vld [vmem:[%s1646_s0 + $0x458] sm:$0xff]  ;;  %v149_v38 = vld [vmem:[%s1646_s0 + $0x440] sm:$0xff]  ;;  %v151_v41 = vld [vmem:[%s1646_s0 + $0x450] sm:$0xff] }
  0x19   :  { %v661_v40 = vpack.c.bf16 %v152_v33, %v144_v32  ;;  %v158_v42 = vld [vmem:[%s1646_s0 + $0x488] sm:$0xff]  ;;  %v160_v44 = vld [vmem:[%s1646_s0 + $0x498] sm:$0xff]  ;;  %v599_v46 = vpack.c.bf16 %v149_v38, %v141_v37  ;;  %v663_v47 = vpack.c.bf16 %v151_v41, %v143_v39  ;;  %v157_v49 = vld [vmem:[%s1646_s0 + $0x480] sm:$0xff] }
  0x1a   :  { %588 = vmatpush1.bf16.msra.mxu0 %v587_v10  ;;  %v166_v43 = vld [vmem:[%s1646_s0 + $0x4c8] sm:$0xff]  ;;  %v168_v45 = vld [vmem:[%s1646_s0 + $0x4d8] sm:$0xff]  ;;  %v165_v50 = vld [vmem:[%s1646_s0 + $0x4c0] sm:$0xff] }
  0x1b   :  { %652 = vmatpush1.bf16.msra.mxu1 %v651_v11  ;;  %590 = vmatprep.subr.bf16.mxu0 %v589_v12  ;;  %v601_v48 = vpack.c.bf16 %v166_v43, %v158_v42  ;;  %v159_v51 = vld [vmem:[%s1646_s0 + $0x490] sm:$0xff]  ;;  %v665_v52 = vpack.c.bf16 %v168_v45, %v160_v44  ;;  %v174_v54 = vld [vmem:[%s1646_s0 + $0x508] sm:$0xff]  ;;  %v176_v56 = vld [vmem:[%s1646_s0 + $0x518] sm:$0xff]  ;;  %v603_v58 = vpack.c.bf16 %v165_v50, %v157_v49 }
  0x1c   :  { %654 = vmatprep.subr.bf16.mxu1 %v653_v16  ;;  %v167_v53 = vld [vmem:[%s1646_s0 + $0x4d0] sm:$0xff]  ;;  %v182_v55 = vld [vmem:[%s1646_s0 + $0x548] sm:$0xff]  ;;  %v184_v57 = vld [vmem:[%s1646_s0 + $0x558] sm:$0xff] }
  0x1d   :  { %v667_v59 = vpack.c.bf16 %v167_v53, %v159_v51  ;;  %v605_v60 = vpack.c.bf16 %v182_v55, %v174_v54  ;;  %v173_v61 = vld [vmem:[%s1646_s0 + $0x500] sm:$0xff]  ;;  %v175_v63 = vld [vmem:[%s1646_s0 + $0x510] sm:$0xff]  ;;  %v669_v0 = vpack.c.bf16 %v184_v57, %v176_v56  ;;  %v190_v2 = vld [vmem:[%s1646_s0 + $0x588] sm:$0xff] }
  0x1e   :  { %592 = vmatpush1.bf16.msra.mxu0 %v591_v22  ;;  %v181_v62 = vld [vmem:[%s1646_s0 + $0x540] sm:$0xff]  ;;  %v183_v1 = vld [vmem:[%s1646_s0 + $0x550] sm:$0xff]  ;;  %v198_v3 = vld [vmem:[%s1646_s0 + $0x5c8] sm:$0xff] }
  0x1f   :  { %656 = vmatpush1.bf16.msra.mxu1 %v655_v23  ;;  %594 = vmatprep.subr.bf16.mxu0 %v593_v24  ;;  %v192_v4 = vld [vmem:[%s1646_s0 + $0x598] sm:$0xff]  ;;  %v607_v6 = vpack.c.bf16 %v181_v62, %v173_v61  ;;  %v189_v7 = vld [vmem:[%s1646_s0 + $0x580] sm:$0xff]  ;;  %v671_v8 = vpack.c.bf16 %v183_v1, %v175_v63  ;;  %v609_v9 = vpack.c.bf16 %v198_v3, %v190_v2  ;;  %v191_v11 = vld [vmem:[%s1646_s0 + $0x590] sm:$0xff] }
  0x20   :  { %658 = vmatprep.subr.bf16.mxu1 %v657_v28  ;;  %v200_v5 = vld [vmem:[%s1646_s0 + $0x5d8] sm:$0xff]  ;;  %v197_v10 = vld [vmem:[%s1646_s0 + $0x5c0] sm:$0xff]  ;;  %v199_v12 = vld [vmem:[%s1646_s0 + $0x5d0] sm:$0xff] }
  0x21   :  { %v673_v13 = vpack.c.bf16 %v200_v5, %v192_v4  ;;  %v206_v14 = vld [vmem:[%s1646_s0 + $0x608] sm:$0xff]  ;;  %v208_v17 = vld [vmem:[%s1646_s0 + $0x618] sm:$0xff]  ;;  %v611_v19 = vpack.c.bf16 %v197_v10, %v189_v7  ;;  %v675_v20 = vpack.c.bf16 %v199_v12, %v191_v11  ;;  %v205_v22 = vld [vmem:[%s1646_s0 + $0x600] sm:$0xff] }
  0x22   :  { %596 = vmatpush1.bf16.msra.mxu0 %v595_v34  ;;  %v214_v15 = vld [vmem:[%s1646_s0 + $0x648] sm:$0xff]  ;;  %v216_v18 = vld [vmem:[%s1646_s0 + $0x658] sm:$0xff]  ;;  %v213_v23 = vld [vmem:[%s1646_s0 + $0x640] sm:$0xff] }
  0x23   :  { %660 = vmatpush1.bf16.msra.mxu1 %v659_v35  ;;  %598 = vmatprep.subr.bf16.mxu0 %v597_v36  ;;  %v1133_v16 = vld [vmem:[%s1647_s1 + $0x8] sm:$0xff]  ;;  %v613_v21 = vpack.c.bf16 %v214_v15, %v206_v14  ;;  %v207_v24 = vld [vmem:[%s1646_s0 + $0x610] sm:$0xff]  ;;  %v677_v25 = vpack.c.bf16 %v216_v18, %v208_v17  ;;  %v224_v29 = vld [vmem:[%s1646_s0 + $0x698] sm:$0xff]  ;;  %v615_v31 = vpack.c.bf16 %v213_v23, %v205_v22 }
  0x24   :  { %662 = vmatprep.subr.bf16.mxu1 %v661_v40  ;;  %333 = vmatprep.mubr.f32.mxu0 %v1133_v16  ;;  %v215_v26 = vld [vmem:[%s1646_s0 + $0x650] sm:$0xff]  ;;  %v222_v27 = vld [vmem:[%s1646_s0 + $0x688] sm:$0xff]  ;;  %v232_v30 = vld [vmem:[%s1646_s0 + $0x6d8] sm:$0xff] }
  0x25   :  { %404 = vmatprep.mubr.f32.mxu1 %v1133_v16  ;;  %v230_v28 = vld [vmem:[%s1646_s0 + $0x6c8] sm:$0xff]  ;;  %v679_v32 = vpack.c.bf16 %v215_v26, %v207_v24  ;;  %v221_v34 = vld [vmem:[%s1646_s0 + $0x680] sm:$0xff]  ;;  %v223_v36 = vld [vmem:[%s1646_s0 + $0x690] sm:$0xff]  ;;  %v681_v37 = vpack.c.bf16 %v232_v30, %v224_v29 }
  0x26   :  { %600 = vmatpush1.bf16.msra.mxu0 %v599_v46  ;;  %v617_v33 = vpack.c.bf16 %v230_v28, %v222_v27  ;;  %v229_v35 = vld [vmem:[%s1646_s0 + $0x6c0] sm:$0xff]  ;;  %v231_v38 = vld [vmem:[%s1646_s0 + $0x6d0] sm:$0xff]  ;;  %v238_v39 = vld [vmem:[%s1646_s0 + $0x708] sm:$0xff] }
  0x27   :  { %664 = vmatpush1.bf16.msra.mxu1 %v663_v47  ;;  %602 = vmatprep.subr.bf16.mxu0 %v601_v48  ;;  %v246_v40 = vld [vmem:[%s1646_s0 + $0x748] sm:$0xff]  ;;  %v240_v41 = vld [vmem:[%s1646_s0 + $0x718] sm:$0xff]  ;;  %v619_v43 = vpack.c.bf16 %v229_v35, %v221_v34  ;;  %v683_v44 = vpack.c.bf16 %v231_v38, %v223_v36  ;;  %v237_v46 = vld [vmem:[%s1646_s0 + $0x700] sm:$0xff] }
  0x28   :  { %666 = vmatprep.subr.bf16.mxu1 %v665_v52  ;;  %v248_v42 = vld [vmem:[%s1646_s0 + $0x758] sm:$0xff]  ;;  %v621_v45 = vpack.c.bf16 %v246_v40, %v238_v39  ;;  %v245_v47 = vld [vmem:[%s1646_s0 + $0x740] sm:$0xff]  ;;  %v239_v48 = vld [vmem:[%s1646_s0 + $0x710] sm:$0xff] }
  0x29   :  { %v685_v49 = vpack.c.bf16 %v248_v42, %v240_v41  ;;  %v247_v50 = vld [vmem:[%s1646_s0 + $0x750] sm:$0xff]  ;;  %v254_v51 = vld [vmem:[%s1646_s0 + $0x788] sm:$0xff]  ;;  %v256_v53 = vld [vmem:[%s1646_s0 + $0x798] sm:$0xff]  ;;  %v623_v55 = vpack.c.bf16 %v245_v47, %v237_v46 }
  0x2a   :  { %604 = vmatpush1.bf16.msra.mxu0 %v603_v58  ;;  %v262_v52 = vld [vmem:[%s1646_s0 + $0x7c8] sm:$0xff]  ;;  %v264_v54 = vld [vmem:[%s1646_s0 + $0x7d8] sm:$0xff]  ;;  %v687_v56 = vpack.c.bf16 %v247_v50, %v239_v48  ;;  %v253_v58 = vld [vmem:[%s1646_s0 + $0x780] sm:$0xff] }
  0x2b   :  { %668 = vmatpush1.bf16.msra.mxu1 %v667_v59  ;;  %606 = vmatprep.subr.bf16.mxu0 %v605_v60  ;;  %v625_v57 = vpack.c.bf16 %v262_v52, %v254_v51  ;;  %v261_v59 = vld [vmem:[%s1646_s0 + $0x7c0] sm:$0xff]  ;;  %v255_v60 = vld [vmem:[%s1646_s0 + $0x790] sm:$0xff]  ;;  %v689_v61 = vpack.c.bf16 %v264_v54, %v256_v53  ;;  %v18_v63 = vld [vmem:[%s1646_s0 + $0x28] sm:$0xff] }
  0x2c   :  { %670 = vmatprep.subr.bf16.mxu1 %v669_v0  ;;  %v263_v62 = vld [vmem:[%s1646_s0 + $0x7d0] sm:$0xff]  ;;  %v26_v0 = vld [vmem:[%s1646_s0 + $0x68] sm:$0xff]  ;;  %v20_v1 = vld [vmem:[%s1646_s0 + $0x38] sm:$0xff]  ;;  %v627_v3 = vpack.c.bf16 %v261_v59, %v253_v58 }
  0x2d   :  { %v28_v2 = vld [vmem:[%s1646_s0 + $0x78] sm:$0xff]  ;;  %v691_v4 = vpack.c.bf16 %v263_v62, %v255_v60  ;;  %v693_v5 = vpack.c.bf16 %v26_v0, %v18_v63  ;;  %v25_v7 = vld [vmem:[%s1646_s0 + $0x60] sm:$0xff]  ;;  %v27_v10 = vld [vmem:[%s1646_s0 + $0x70] sm:$0xff] }
  0x2e   :  { %608 = vmatpush1.bf16.msra.mxu0 %v607_v6  ;;  %v17_v6 = vld [vmem:[%s1646_s0 + $0x20] sm:$0xff]  ;;  %v34_v11 = vld [vmem:[%s1646_s0 + $0xa8] sm:$0xff]  ;;  %v44_v14 = vld [vmem:[%s1646_s0 + $0xf8] sm:$0xff] }
  0x2f   :  { %672 = vmatpush1.bf16.msra.mxu1 %v671_v8  ;;  %610 = vmatprep.subr.bf16.mxu0 %v609_v9  ;;  %v19_v8 = vld [vmem:[%s1646_s0 + $0x30] sm:$0xff]  ;;  %v757_v9 = vpack.c.bf16 %v28_v2, %v20_v1  ;;  %v42_v12 = vld [vmem:[%s1646_s0 + $0xe8] sm:$0xff]  ;;  %v1266_v15 = vld [vmem:[%s1647_s1] sm:$0xff]  ;;  %v695_v17 = vpack.c.bf16 %v25_v7, %v17_v6 }
  0x30   :  { %674 = vmatprep.subr.bf16.mxu1 %v673_v13  ;;  %v36_v13 = vld [vmem:[%s1646_s0 + $0xb8] sm:$0xff]  ;;  %v759_v18 = vpack.c.bf16 %v27_v10, %v19_v8  ;;  %v35_v22 = vld [vmem:[%s1646_s0 + $0xb0] sm:$0xff]  ;;  %v58_v26 = vld [vmem:[%s1646_s0 + $0x168] sm:$0xff] }
  0x31   :  { %v761_v23 = vpack.c.bf16 %v44_v14, %v36_v13  ;;  %v43_v24 = vld [vmem:[%s1646_s0 + $0xf0] sm:$0xff]  ;;  %v52_v27 = vld [vmem:[%s1646_s0 + $0x138] sm:$0xff]  ;;  %v74_v38 = vld [vmem:[%s1646_s0 + $0x1e8] sm:$0xff] }
  0x32   :  { %612 = vmatpush1.bf16.msra.mxu0 %v611_v19  ;;  %v697_v19 = vpack.c.bf16 %v42_v12, %v34_v11  ;;  %v60_v28 = vld [vmem:[%s1646_s0 + $0x178] sm:$0xff]  ;;  %v763_v30 = vpack.c.bf16 %v43_v24, %v35_v22  ;;  %v51_v34 = vld [vmem:[%s1646_s0 + $0x130] sm:$0xff]  ;;  %v82_v48 = vld [vmem:[%s1646_s0 + $0x228] sm:$0xff] }
  0x33   :  { %676 = vmatpush1.bf16.msra.mxu1 %v675_v20  ;;  %614 = vmatprep.subr.bf16.mxu0 %v613_v21  ;;  %v33_v20 = vld [vmem:[%s1646_s0 + $0xa0] sm:$0xff]  ;;  %v765_v35 = vpack.c.bf16 %v60_v28, %v52_v27  ;;  %v59_v36 = vld [vmem:[%s1646_s0 + $0x170] sm:$0xff]  ;;  %v68_v39 = vld [vmem:[%s1646_s0 + $0x1b8] sm:$0xff] }
  0x34   :  { %678 = vmatprep.subr.bf16.mxu1 %v677_v25  ;;  %v41_v21 = vld [vmem:[%s1646_s0 + $0xe0] sm:$0xff]  ;;  %v50_v25 = vld [vmem:[%s1646_s0 + $0x128] sm:$0xff]  ;;  %v76_v40 = vld [vmem:[%s1646_s0 + $0x1f8] sm:$0xff]  ;;  %v767_v42 = vpack.c.bf16 %v59_v36, %v51_v34 }
  0x35   :  { %v699_v29 = vpack.c.bf16 %v41_v21, %v33_v20  ;;  %v67_v46 = vld [vmem:[%s1646_s0 + $0x1b0] sm:$0xff]  ;;  %v84_v50 = vld [vmem:[%s1646_s0 + $0x238] sm:$0xff]  ;;  %v98_v60 = vld [vmem:[%s1646_s0 + $0x2a8] sm:$0xff] }
  0x36   :  { %616 = vmatpush1.bf16.msra.mxu0 %v615_v31  ;;  %v701_v31 = vpack.c.bf16 %v58_v26, %v50_v25  ;;  %v75_v47 = vld [vmem:[%s1646_s0 + $0x1f0] sm:$0xff]  ;;  %v92_v51 = vld [vmem:[%s1646_s0 + $0x278] sm:$0xff]  ;;  %v114_v8 = vld [vmem:[%s1646_s0 + $0x328] sm:$0xff] }
  0x37   :  { %680 = vmatpush1.bf16.msra.mxu1 %v679_v32  ;;  %618 = vmatprep.subr.bf16.mxu0 %v617_v33  ;;  %v49_v32 = vld [vmem:[%s1646_s0 + $0x120] sm:$0xff]  ;;  %v771_v53 = vpack.c.bf16 %v75_v47, %v67_v46  ;;  %v773_v58 = vpack.c.bf16 %v92_v51, %v84_v50  ;;  %v91_v59 = vld [vmem:[%s1646_s0 + $0x270] sm:$0xff]  ;;  %v100_v62 = vld [vmem:[%s1646_s0 + $0x2b8] sm:$0xff] }
  0x38   :  { %682 = vmatprep.subr.bf16.mxu1 %v681_v37  ;;  %v57_v33 = vld [vmem:[%s1646_s0 + $0x160] sm:$0xff]  ;;  %v66_v37 = vld [vmem:[%s1646_s0 + $0x1a8] sm:$0xff]  ;;  %v108_v63 = vld [vmem:[%s1646_s0 + $0x2f8] sm:$0xff] }
  0x39   :  { %v703_v41 = vpack.c.bf16 %v57_v33, %v49_v32  ;;  %v777_v6 = vpack.c.bf16 %v108_v63, %v100_v62  ;;  %v107_v7 = vld [vmem:[%s1646_s0 + $0x2f0] sm:$0xff]  ;;  %v116_v10 = vld [vmem:[%s1646_s0 + $0x338] sm:$0xff]  ;;  %v130_v22 = vld [vmem:[%s1646_s0 + $0x3a8] sm:$0xff] }
  0x3a   :  { %620 = vmatpush1.bf16.msra.mxu0 %v619_v43  ;;  %v705_v43 = vpack.c.bf16 %v74_v38, %v66_v37  ;;  %v124_v11 = vld [vmem:[%s1646_s0 + $0x378] sm:$0xff]  ;;  %v123_v21 = vld [vmem:[%s1646_s0 + $0x370] sm:$0xff]  ;;  %v146_v34 = vld [vmem:[%s1646_s0 + $0x428] sm:$0xff] }
  0x3b   :  { %684 = vmatpush1.bf16.msra.mxu1 %v683_v44  ;;  %622 = vmatprep.subr.bf16.mxu0 %v621_v45  ;;  %v65_v44 = vld [vmem:[%s1646_s0 + $0x1a0] sm:$0xff]  ;;  %v781_v20 = vpack.c.bf16 %v124_v11, %v116_v10  ;;  %v132_v24 = vld [vmem:[%s1646_s0 + $0x3b8] sm:$0xff]  ;;  %v139_v33 = vld [vmem:[%s1646_s0 + $0x3f0] sm:$0xff] }
  0x3c   :  { %686 = vmatprep.subr.bf16.mxu1 %v685_v49  ;;  %v73_v45 = vld [vmem:[%s1646_s0 + $0x1e0] sm:$0xff]  ;;  %v90_v49 = vld [vmem:[%s1646_s0 + $0x268] sm:$0xff]  ;;  %v140_v25 = vld [vmem:[%s1646_s0 + $0x3f8] sm:$0xff] }
  0x3d   :  { %v707_v52 = vpack.c.bf16 %v73_v45, %v65_v44  ;;  %v709_v54 = vpack.c.bf16 %v90_v49, %v82_v48  ;;  %v785_v32 = vpack.c.bf16 %v140_v25, %v132_v24  ;;  %v148_v36 = vld [vmem:[%s1646_s0 + $0x438] sm:$0xff]  ;;  %v155_v45 = vld [vmem:[%s1646_s0 + $0x470] sm:$0xff]  ;;  %v162_v46 = vld [vmem:[%s1646_s0 + $0x4a8] sm:$0xff] }
  0x3e   :  { %624 = vmatpush1.bf16.msra.mxu0 %v623_v55  ;;  %v81_v55 = vld [vmem:[%s1646_s0 + $0x220] sm:$0xff]  ;;  %v156_v37 = vld [vmem:[%s1646_s0 + $0x478] sm:$0xff] }
  0x3f   :  { %688 = vmatpush1.bf16.msra.mxu1 %v687_v56  ;;  %626 = vmatprep.subr.bf16.mxu0 %v625_v57  ;;  %v89_v56 = vld [vmem:[%s1646_s0 + $0x260] sm:$0xff]  ;;  %v83_v57 = vld [vmem:[%s1646_s0 + $0x230] sm:$0xff]  ;;  %v789_v44 = vpack.c.bf16 %v156_v37, %v148_v36  ;;  %v164_v47 = vld [vmem:[%s1646_s0 + $0x4b8] sm:$0xff] }
  0x40   :  { %690 = vmatprep.subr.bf16.mxu1 %v689_v61  ;;  %v106_v61 = vld [vmem:[%s1646_s0 + $0x2e8] sm:$0xff]  ;;  %v711_v0 = vpack.c.bf16 %v89_v56, %v81_v55  ;;  %v775_v1 = vpack.c.bf16 %v91_v59, %v83_v57  ;;  %v172_v48 = vld [vmem:[%s1646_s0 + $0x4f8] sm:$0xff]  ;;  %v171_v56 = vld [vmem:[%s1646_s0 + $0x4f0] sm:$0xff] }
  0x41   :  { %v713_v2 = vpack.c.bf16 %v106_v61, %v98_v60  ;;  %v793_v55 = vpack.c.bf16 %v172_v48, %v164_v47  ;;  %v178_v57 = vld [vmem:[%s1646_s0 + $0x528] sm:$0xff]  ;;  %v180_v59 = vld [vmem:[%s1646_s0 + $0x538] sm:$0xff] }
  0x42   :  { %628 = vmatpush1.bf16.msra.mxu0 %v627_v3  ;;  %v97_v3 = vld [vmem:[%s1646_s0 + $0x2a0] sm:$0xff]  ;;  %v188_v60 = vld [vmem:[%s1646_s0 + $0x578] sm:$0xff] }
  0x43   :  { %692 = vmatpush1.bf16.msra.mxu1 %v691_v4  ;;  %694 = vmatprep.subr.bf16.mxu0 %v693_v5  ;;  %v105_v4 = vld [vmem:[%s1646_s0 + $0x2e0] sm:$0xff]  ;;  %v99_v5 = vld [vmem:[%s1646_s0 + $0x2b0] sm:$0xff] }
  0x44   :  { %758 = vmatprep.subr.bf16.mxu1 %v757_v9  ;;  %v122_v9 = vld [vmem:[%s1646_s0 + $0x368] sm:$0xff]  ;;  %v715_v12 = vpack.c.bf16 %v105_v4, %v97_v3  ;;  %v779_v13 = vpack.c.bf16 %v107_v7, %v99_v5  ;;  %v797_v3 = vpack.c.bf16 %v188_v60, %v180_v59  ;;  %v187_v4 = vld [vmem:[%s1646_s0 + $0x570] sm:$0xff]  ;;  %v196_v7 = vld [vmem:[%s1646_s0 + $0x5b8] sm:$0xff] }
  0x45   :  { %334 = vmatmul.mubr.f32.vlgmr.msra.gmra.mrb[0].mxu0 %v1266_v15  ;;  %v717_v14 = vpack.c.bf16 %v122_v9, %v114_v8  ;;  %v194_v5 = vld [vmem:[%s1646_s0 + $0x5a8] sm:$0xff]  ;;  %v204_v8 = vld [vmem:[%s1646_s0 + $0x5f8] sm:$0xff] }
  0x46   :  { %405 = vmatmul.mubr.f32.vlgmr.msra.gmra.mrb[0].mxu1 %v1266_v15  ;;  %696 = vmatpush1.bf16.msra.mxu0 %v695_v17  ;;  %v113_v17 = vld [vmem:[%s1646_s0 + $0x320] sm:$0xff] }
  0x47   :  { %760 = vmatpush1.bf16.msra.mxu1 %v759_v18  ;;  %698 = vmatprep.subr.bf16.mxu0 %v697_v19  ;;  %v121_v18 = vld [vmem:[%s1646_s0 + $0x360] sm:$0xff]  ;;  %v115_v19 = vld [vmem:[%s1646_s0 + $0x330] sm:$0xff] }
  0x48   :  { %762 = vmatprep.subr.bf16.mxu1 %v761_v23  ;;  %475 = vmatprep.mubr.f32.mxu0 %v1133_v16  ;;  %v138_v23 = vld [vmem:[%s1646_s0 + $0x3e8] sm:$0xff]  ;;  %v719_v26 = vpack.c.bf16 %v121_v18, %v113_v17  ;;  %v783_v27 = vpack.c.bf16 %v123_v21, %v115_v19  ;;  %v801_v17 = vpack.c.bf16 %v204_v8, %v196_v7  ;;  %v203_v18 = vld [vmem:[%s1646_s0 + $0x5f0] sm:$0xff]  ;;  %v212_v21 = vld [vmem:[%s1646_s0 + $0x638] sm:$0xff] }
  0x49   :  { %546 = vmatprep.mubr.f32.mxu1 %v1133_v16  ;;  %v769_v16 = vpack.c.bf16 %v76_v40, %v68_v39  ;;  %v721_v28 = vpack.c.bf16 %v138_v23, %v130_v22  ;;  %v210_v19 = vld [vmem:[%s1646_s0 + $0x628] sm:$0xff]  ;;  %v220_v22 = vld [vmem:[%s1646_s0 + $0x678] sm:$0xff] }
  0x4a   :  { %700 = vmatpush1.bf16.msra.mxu0 %v699_v29  ;;  %v129_v29 = vld [vmem:[%s1646_s0 + $0x3a0] sm:$0xff] }
  0x4b   :  { %764 = vmatpush1.bf16.msra.mxu1 %v763_v30  ;;  %702 = vmatprep.subr.bf16.mxu0 %v701_v31  ;;  %v137_v30 = vld [vmem:[%s1646_s0 + $0x3e0] sm:$0xff]  ;;  %v131_v31 = vld [vmem:[%s1646_s0 + $0x3b0] sm:$0xff] }
  0x4c   :  { %766 = vmatprep.subr.bf16.mxu1 %v765_v35  ;;  %v154_v35 = vld [vmem:[%s1646_s0 + $0x468] sm:$0xff]  ;;  %v723_v38 = vpack.c.bf16 %v137_v30, %v129_v29  ;;  %v787_v39 = vpack.c.bf16 %v139_v33, %v131_v31  ;;  %v805_v29 = vpack.c.bf16 %v220_v22, %v212_v21  ;;  %v219_v30 = vld [vmem:[%s1646_s0 + $0x670] sm:$0xff]  ;;  %v228_v33 = vld [vmem:[%s1646_s0 + $0x6b8] sm:$0xff] }
  0x4d   :  { %v725_v40 = vpack.c.bf16 %v154_v35, %v146_v34  ;;  %v226_v31 = vld [vmem:[%s1646_s0 + $0x6a8] sm:$0xff]  ;;  %v236_v34 = vld [vmem:[%s1646_s0 + $0x6f8] sm:$0xff] }
  0x4e   :  { %704 = vmatpush1.bf16.msra.mxu0 %v703_v41  ;;  %v145_v41 = vld [vmem:[%s1646_s0 + $0x420] sm:$0xff] }
  0x4f   :  { %768 = vmatpush1.bf16.msra.mxu1 %v767_v42  ;;  %706 = vmatprep.subr.bf16.mxu0 %v705_v43  ;;  %v153_v42 = vld [vmem:[%s1646_s0 + $0x460] sm:$0xff]  ;;  %v147_v43 = vld [vmem:[%s1646_s0 + $0x430] sm:$0xff] }
  0x50   :  { %770 = vmatprep.subr.bf16.mxu1 %v769_v16  ;;  %v170_v16 = vld [vmem:[%s1646_s0 + $0x4e8] sm:$0xff]  ;;  %v727_v49 = vpack.c.bf16 %v153_v42, %v145_v41  ;;  %v791_v50 = vpack.c.bf16 %v155_v45, %v147_v43  ;;  %v809_v41 = vpack.c.bf16 %v236_v34, %v228_v33  ;;  %v235_v42 = vld [vmem:[%s1646_s0 + $0x6f0] sm:$0xff]  ;;  %v244_v45 = vld [vmem:[%s1646_s0 + $0x738] sm:$0xff] }
  0x51   :  { %v729_v51 = vpack.c.bf16 %v170_v16, %v162_v46  ;;  %v242_v43 = vld [vmem:[%s1646_s0 + $0x728] sm:$0xff]  ;;  %v252_v46 = vld [vmem:[%s1646_s0 + $0x778] sm:$0xff] }
  0x52   :  { %708 = vmatpush1.bf16.msra.mxu0 %v707_v52  ;;  %v161_v52 = vld [vmem:[%s1646_s0 + $0x4a0] sm:$0xff] }
  0x53   :  { %772 = vmatpush1.bf16.msra.mxu1 %v771_v53  ;;  %710 = vmatprep.subr.bf16.mxu0 %v709_v54  ;;  %v169_v53 = vld [vmem:[%s1646_s0 + $0x4e0] sm:$0xff]  ;;  %v163_v54 = vld [vmem:[%s1646_s0 + $0x4b0] sm:$0xff] }
  0x54   :  { %774 = vmatprep.subr.bf16.mxu1 %v773_v58  ;;  %v186_v58 = vld [vmem:[%s1646_s0 + $0x568] sm:$0xff]  ;;  %v731_v61 = vpack.c.bf16 %v169_v53, %v161_v52  ;;  %v795_v62 = vpack.c.bf16 %v171_v56, %v163_v54  ;;  %v813_v52 = vpack.c.bf16 %v252_v46, %v244_v45  ;;  %v251_v53 = vld [vmem:[%s1646_s0 + $0x770] sm:$0xff]  ;;  %v260_v56 = vld [vmem:[%s1646_s0 + $0x7b8] sm:$0xff] }
  0x55   :  { %v733_v63 = vpack.c.bf16 %v186_v58, %v178_v57  ;;  %v258_v54 = vld [vmem:[%s1646_s0 + $0x7a8] sm:$0xff]  ;;  %v268_v57 = vld [vmem:[%s1646_s0 + $0x7f8] sm:$0xff] }
  0x56   :  { %712 = vmatpush1.bf16.msra.mxu0 %v711_v0  ;;  %v177_v0 = vld [vmem:[%s1646_s0 + $0x520] sm:$0xff] }
  0x57   :  { %776 = vmatpush1.bf16.msra.mxu1 %v775_v1  ;;  %714 = vmatprep.subr.bf16.mxu0 %v713_v2  ;;  %v185_v1 = vld [vmem:[%s1646_s0 + $0x560] sm:$0xff]  ;;  %v179_v2 = vld [vmem:[%s1646_s0 + $0x530] sm:$0xff] }
  0x58   :  { %778 = vmatprep.subr.bf16.mxu1 %v777_v6  ;;  %v202_v6 = vld [vmem:[%s1646_s0 + $0x5e8] sm:$0xff]  ;;  %v735_v9 = vpack.c.bf16 %v185_v1, %v177_v0  ;;  %v799_v10 = vpack.c.bf16 %v187_v4, %v179_v2  ;;  %v259_v0 = vld [vmem:[%s1646_s0 + $0x7b0] sm:$0xff] }
  0x59   :  { %v737_v11 = vpack.c.bf16 %v202_v6, %v194_v5  ;;  %v267_v1 = vld [vmem:[%s1646_s0 + $0x7f0] sm:$0xff] }
  0x5a   :  { %716 = vmatpush1.bf16.msra.mxu0 %v715_v12  ;;  %v193_v12 = vld [vmem:[%s1646_s0 + $0x5a0] sm:$0xff] }
  0x5b   :  { %780 = vmatpush1.bf16.msra.mxu1 %v779_v13  ;;  %718 = vmatprep.subr.bf16.mxu0 %v717_v14  ;;  %v201_v13 = vld [vmem:[%s1646_s0 + $0x5e0] sm:$0xff]  ;;  %v195_v14 = vld [vmem:[%s1646_s0 + $0x5b0] sm:$0xff] }
  0x5c   :  { %782 = vmatprep.subr.bf16.mxu1 %v781_v20  ;;  %v218_v20 = vld [vmem:[%s1646_s0 + $0x668] sm:$0xff]  ;;  %v739_v23 = vpack.c.bf16 %v201_v13, %v193_v12  ;;  %v803_v24 = vpack.c.bf16 %v203_v18, %v195_v14 }
  0x5d   :  { %v741_v25 = vpack.c.bf16 %v218_v20, %v210_v19 }
  0x5e   :  { %720 = vmatpush1.bf16.msra.mxu0 %v719_v26  ;;  %v209_v26 = vld [vmem:[%s1646_s0 + $0x620] sm:$0xff] }
  0x5f   :  { %784 = vmatpush1.bf16.msra.mxu1 %v783_v27  ;;  %722 = vmatprep.subr.bf16.mxu0 %v721_v28  ;;  %v217_v27 = vld [vmem:[%s1646_s0 + $0x660] sm:$0xff]  ;;  %v211_v28 = vld [vmem:[%s1646_s0 + $0x630] sm:$0xff] }
  0x60   :  { %786 = vmatprep.subr.bf16.mxu1 %v785_v32  ;;  %v234_v32 = vld [vmem:[%s1646_s0 + $0x6e8] sm:$0xff]  ;;  %v743_v35 = vpack.c.bf16 %v217_v27, %v209_v26  ;;  %v807_v36 = vpack.c.bf16 %v219_v30, %v211_v28 }
  0x61   :  { %v745_v37 = vpack.c.bf16 %v234_v32, %v226_v31 }
  0x62   :  { %724 = vmatpush1.bf16.msra.mxu0 %v723_v38  ;;  %v225_v38 = vld [vmem:[%s1646_s0 + $0x6a0] sm:$0xff] }
  0x63   :  { %788 = vmatpush1.bf16.msra.mxu1 %v787_v39  ;;  %726 = vmatprep.subr.bf16.mxu0 %v725_v40  ;;  %v233_v39 = vld [vmem:[%s1646_s0 + $0x6e0] sm:$0xff]  ;;  %v227_v40 = vld [vmem:[%s1646_s0 + $0x6b0] sm:$0xff] }
  0x64   :  { %790 = vmatprep.subr.bf16.mxu1 %v789_v44  ;;  %v250_v44 = vld [vmem:[%s1646_s0 + $0x768] sm:$0xff]  ;;  %v747_v16 = vpack.c.bf16 %v233_v39, %v225_v38  ;;  %v811_v47 = vpack.c.bf16 %v235_v42, %v227_v40 }
  0x65   :  { %v749_v48 = vpack.c.bf16 %v250_v44, %v242_v43 }
  0x66   :  { %728 = vmatpush1.bf16.msra.mxu0 %v727_v49  ;;  %v241_v49 = vld [vmem:[%s1646_s0 + $0x720] sm:$0xff] }
  0x67   :  { %792 = vmatpush1.bf16.msra.mxu1 %v791_v50  ;;  %730 = vmatprep.subr.bf16.mxu0 %v729_v51  ;;  %v249_v50 = vld [vmem:[%s1646_s0 + $0x760] sm:$0xff]  ;;  %v243_v51 = vld [vmem:[%s1646_s0 + $0x730] sm:$0xff] }
  0x68   :  { %794 = vmatprep.subr.bf16.mxu1 %v793_v55  ;;  %v266_v55 = vld [vmem:[%s1646_s0 + $0x7e8] sm:$0xff]  ;;  %v751_v58 = vpack.c.bf16 %v249_v50, %v241_v49  ;;  %v815_v59 = vpack.c.bf16 %v251_v53, %v243_v51 }
  0x69   :  { %v753_v60 = vpack.c.bf16 %v266_v55, %v258_v54 }
  0x6a   :  { %732 = vmatpush1.bf16.msra.mxu0 %v731_v61  ;;  %v257_v61 = vld [vmem:[%s1646_s0 + $0x7a0] sm:$0xff] }
  0x6b   :  { %796 = vmatpush1.bf16.msra.mxu1 %v795_v62  ;;  %734 = vmatprep.subr.bf16.mxu0 %v733_v63  ;;  %v265_v62 = vld [vmem:[%s1646_s0 + $0x7e0] sm:$0xff]  ;;  %v817_v63 = vpack.c.bf16 %v268_v57, %v260_v56 }
  0x6c   :  { %798 = vmatprep.subr.bf16.mxu1 %v797_v3  ;;  %v755_v2 = vpack.c.bf16 %v265_v62, %v257_v61  ;;  %v819_v3 = vpack.c.bf16 %v267_v1, %v259_v0 }
  0x6e   :  { %736 = vmatpush1.bf16.msra.mxu0 %v735_v9 }
  0x6f   :  { %800 = vmatpush1.bf16.msra.mxu1 %v799_v10  ;;  %738 = vmatprep.subr.bf16.mxu0 %v737_v11 }
  0x70   :  { %802 = vmatprep.subr.bf16.mxu1 %v801_v17 }
  0x72   :  { %740 = vmatpush1.bf16.msra.mxu0 %v739_v23 }
  0x73   :  { %804 = vmatpush1.bf16.msra.mxu1 %v803_v24  ;;  %742 = vmatprep.subr.bf16.mxu0 %v741_v25 }
  0x74   :  { %806 = vmatprep.subr.bf16.mxu1 %v805_v29 }
  0x76   :  { %744 = vmatpush1.bf16.msra.mxu0 %v743_v35 }
  0x77   :  { %808 = vmatpush1.bf16.msra.mxu1 %v807_v36  ;;  %746 = vmatprep.subr.bf16.mxu0 %v745_v37 }
  0x78   :  { %810 = vmatprep.subr.bf16.mxu1 %v809_v41 }
  0x7a   :  { %748 = vmatpush1.bf16.msra.mxu0 %v747_v16 }
  0x7b   :  { %812 = vmatpush1.bf16.msra.mxu1 %v811_v47  ;;  %750 = vmatprep.subr.bf16.mxu0 %v749_v48 }
  0x7c   :  { %814 = vmatprep.subr.bf16.mxu1 %v813_v52 }
  0x7e   :  { %752 = vmatpush1.bf16.msra.mxu0 %v751_v58 }
  0x7f   :  { %816 = vmatpush1.bf16.msra.mxu1 %v815_v59  ;;  %754 = vmatprep.subr.bf16.mxu0 %v753_v60 }
  0x80   :  { %818 = vmatprep.subr.bf16.mxu1 %v817_v63 }
  0x82   :  { %756 = vmatpush1.bf16.msra.mxu0 %v755_v2 }
  0x83   :  { %820 = vmatpush1.bf16.msra.mxu1 %v819_v3 }
  0x85   :  { %476 = vmatmul.mubr.f32.vlgmr.msra.gmra.mrb[2].mxu0 %v1266_v15 }
  0x86   :  { %547 = vmatmul.mubr.f32.vlgmr.msra.gmra.mrb[2].mxu1 %v1266_v15 }
 0x118   :  { %v335_v4 = vpop.f32.mrb[0].mxu0 }
 0x119   :  { %553 = vst [vmem:[%s1648_s2] sm:$0xff] %v335_v4  ;;  %v406_v5 = vpop.f32.mrb[0].mxu1  ;;  %v337_v6 = vpop.f32.mrb[1].mxu0 }
 0x11a   :  { %555 = vst [vmem:[%s1648_s2 + $0x10] sm:$0xff] %v406_v5  ;;  %554 = vst [vmem:[%s1648_s2 + $0x8] sm:$0xff] %v337_v6  ;;  %v408_v7 = vpop.f32.mrb[1].mxu1 }
 0x11b   :  { %556 = vst [vmem:[%s1648_s2 + $0x18] sm:$0xff] %v408_v7 }
 0x158   :  { %v477_v15 = vpop.f32.mrb[2].mxu0 }
 0x159   :  { %557 = vst [vmem:[%s1648_s2 + $0x20] sm:$0xff] %v477_v15  ;;  %v548_v8 = vpop.f32.mrb[2].mxu1  ;;  %v479_v9 = vpop.f32.mrb[3].mxu0 }
 0x15a   :  { %559 = vst [vmem:[%s1648_s2 + $0x30] sm:$0xff] %v548_v8  ;;  %558 = vst [vmem:[%s1648_s2 + $0x28] sm:$0xff] %v479_v9  ;;  %v550_v10 = vpop.f32.mrb[3].mxu1 }
 0x15b   :  { %560 = vst [vmem:[%s1648_s2 + $0x38] sm:$0xff] %v550_v10 }

</bundles_post_ra>
